<compile_context>
chip_gen: v5e
topology: v5e:2x2
jax: 0.10.0
libtpu: 0.0.40
codegen_flags: <defaults>
</compile_context>

<pallas_src>
import jax
import jax.numpy as jnp
from jax.experimental import pallas as pl
from jax.experimental.pallas import tpu as pltpu


_LANE = 128
_SUBLANE_F32 = 8
_TARGET_BLOCK_BYTES = 4 << 20      # ~4 MiB of input per block
_MAX_TILE_COLS = 16384             # lane-axis tile cap (keeps param tiles small)
_MIN_BLOCKS = 2                    # give both v7x TensorCores work
_MIN_SPLIT_BYTES = 512 << 10       # only force a split when >= 512 KiB of data
_VMEM_LIMIT_BYTES = 32 << 20       # safe on v5e/v6e/v7x (physical >= 64 MiB)


def _choose_tiles(nrows, ncols, itemsize):
    """Pick (tile_rows, tile_cols): last dims multiples of (sublane,128) or full."""
    sublane = max(_SUBLANE_F32, 32 // itemsize)   # 8 / 16 / 32 for f32 / bf16 / int8

    # Lane (last-dim) tile: full width when modest, else a 128-multiple chunk.
    if ncols <= _MAX_TILE_COLS:
        tile_cols = ncols                          # full dim is always legal
    else:
        tile_cols = min((ncols // _LANE) * _LANE, _MAX_TILE_COLS)

    # Sublane tile: fill the byte budget (no separate row cap); round partial
    # tiles to the native packing multiple.
    rows_budget = max(_TARGET_BLOCK_BYTES // (tile_cols * itemsize), 1)
    tile_rows = min(rows_budget, nrows)
    if tile_rows < nrows:
        tile_rows = max(sublane, (tile_rows // sublane) * sublane)

    # Ensure >= _MIN_BLOCKS blocks when there is enough data (v7x: 2 TCs).
    total_bytes = nrows * ncols * itemsize
    n_blocks = pl.cdiv(nrows, tile_rows) * pl.cdiv(ncols, tile_cols)
    if n_blocks < _MIN_BLOCKS and total_bytes >= _MIN_SPLIT_BYTES:
        if nrows >= _MIN_BLOCKS * sublane:
            per = pl.cdiv(nrows, _MIN_BLOCKS)
            tile_rows = max(sublane, pl.cdiv(per, sublane) * sublane)
        elif ncols >= _MIN_BLOCKS * _LANE:
            per = pl.cdiv(ncols, _MIN_BLOCKS)
            tile_cols = max(_LANE, pl.cdiv(per, _LANE) * _LANE)

    return tile_rows, tile_cols


def _actnorm_kernel(x_ref, loc_ref, scale_ref, o_ref):
    # x_ref / o_ref:       (tile_rows, tile_cols)            VMEM
    # loc_ref / scale_ref: (tile_rows, 1) or (1, tile_cols)  VMEM f32 (broadcast)
    h = scale_ref[...] * (x_ref[...] + loc_ref[...])
    o_ref[...] = h.astype(o_ref.dtype)


def _actnorm_logdet_kernel(x_ref, loc_ref, scale_ref, c_ref, o_ref, dl_ref):
    # Fused logdet: dlogdet = h * (W * sum(log|scale|)), c_ref is (1,1) f32.
    h = scale_ref[...] * (x_ref[...] + loc_ref[...])
    o_ref[...] = h.astype(o_ref.dtype)
    dl_ref[...] = (h * c_ref[...]).astype(dl_ref.dtype)


def _pallas_affine(x2, loc2, scale2, dlog_const=None):
    """out = scale2 * (x2 + loc2); loc2/scale2 are (R,1) or (1,C) f32.

    If dlog_const (shape (1,1) f32) is given, also returns out * dlog_const,
    fused into the same HBM pass.
    """
    rows, cols = x2.shape
    itemsize = x2.dtype.itemsize
    tile_rows, tile_cols = _choose_tiles(rows, cols, itemsize)
    grid = (pl.cdiv(rows, tile_rows), pl.cdiv(cols, tile_cols))

    x_spec = pl.BlockSpec((tile_rows, tile_cols), lambda i, j: (i, j))
    if loc2.shape[0] == 1:
        # Per-column params (1, C): broadcast over sublanes.
        p_spec = pl.BlockSpec((1, tile_cols), lambda i, j: (0, j))
    else:
        # Per-row params (R, 1): broadcast over lanes.  Indexed by the row
        # block only -> no re-DMA during the inner column sweep.
        p_spec = pl.BlockSpec((tile_rows, 1), lambda i, j: (i, 0))

    in_specs = [x_spec, p_spec, p_spec]
    args = (x2, loc2, scale2)

    if dlog_const is None:
        kernel = _actnorm_kernel
        out_shape = jax.ShapeDtypeStruct((rows, cols), x2.dtype)
        out_specs = x_spec
        n_out = 1
    else:
        kernel = _actnorm_logdet_kernel
        in_specs = in_specs + [pl.BlockSpec((1, 1), lambda i, j: (0, 0))]
        args = args + (dlog_const,)
        out_shape = (jax.ShapeDtypeStruct((rows, cols), x2.dtype),
                     jax.ShapeDtypeStruct((rows, cols), x2.dtype))
        out_specs = [x_spec, x_spec]
        n_out = 2

    cost = pl.CostEstimate(
        flops=(1 + n_out) * rows * cols,
        transcendentals=0,
        bytes_accessed=(1 + n_out) * rows * cols * itemsize
        + (int(loc2.size) + int(scale2.size)) * 4,
    )

    return pl.pallas_call(
        kernel,
        out_shape=out_shape,
        grid_spec=pltpu.PrefetchScalarGridSpec(
            num_scalar_prefetch=0,
            grid=grid,
            in_specs=in_specs,
            out_specs=out_specs,
        ),
        compiler_params=pltpu.CompilerParams(
            dimension_semantics=("parallel", "parallel"),
            vmem_limit_bytes=_VMEM_LIMIT_BYTES,
        ),
        cost_estimate=cost,
    )(*args)


def actnorm_forward(x, loc, scale, *, logdet=False, reverse=False):
    """ActNorm forward / reverse (already-initialized / eval semantics).

    x:     (N, C, H, W) or (N, C)
    loc:   per-channel shift, any shape reshapeable to (C,)  (PyTorch (1,C,1,1))
    scale: per-channel scale, same
    """
    loc = loc.reshape(-1).astype(jnp.float32)
    scale = scale.reshape(-1).astype(jnp.float32)

    if reverse:
        # x / scale - loc == (1/scale) * (x + (-scale * loc)), computed in f32.
        eff_scale = 1.0 / scale
        eff_loc = -scale * loc
    else:
        eff_scale = scale
        eff_loc = loc

    squeeze = x.ndim == 2
    if squeeze:
        # Channels stay on the lane axis; params broadcast over the batch
        # (sublane) axis.  Module semantics: 2-D input is treated as (N,C,1,1),
        # so the effective width is 1.
        N, C = x.shape
        W = 1
        x2 = x
        loc2 = eff_loc.reshape(1, C)
        scale2 = eff_scale.reshape(1, C)
        reshape_out = lambda a: a
    else:
        N, C, H, W = x.shape
        HW = H * W
        if HW < _LANE:
            # Lane-density guard: fold C into the lane axis so stores stay
            # unmasked; params expand to (1, C*H*W) (tiny, grid-resident).
            x2 = x.reshape(N, C * HW)
            loc2 = jnp.repeat(eff_loc, HW).reshape(1, C * HW)
            scale2 = jnp.repeat(eff_scale, HW).reshape(1, C * HW)
        else:
            x2 = x.reshape(N * C, HW)
            # Tiny (N*C,) param expansion: row n*C + c -> channel c.
            loc2 = jnp.tile(eff_loc, (N,)).reshape(N * C, 1)
            scale2 = jnp.tile(eff_scale, (N,)).reshape(N * C, 1)
        reshape_out = lambda a: a.reshape(N, C, H, W)

    want_logdet = logdet and not reverse   # module's reverse() never returns logdet
    if want_logdet:
        # NOTE: literal reproduction of the reference module, where the output
        # tensor `h` shadows the height variable, so dlogdet is tensor-valued:
        # dlogdet = h_tensor * W * sum(log|scale|).  Fused into the kernel as a
        # second output (single HBM pass over x).
        dlog_const = (W * jnp.sum(jnp.log(jnp.abs(scale)))).reshape(1, 1)
        dlog_const = dlog_const.astype(jnp.float32)
        h2, dl2 = _pallas_affine(x2, loc2, scale2, dlog_const)
        return reshape_out(h2), reshape_out(dl2)

    h2 = _pallas_affine(x2, loc2, scale2)
    return reshape_out(h2)


# TODO(synk): training-mode lazy initialization (data-dependent update of the
# stateful `initialized` buffer and loc/scale parameters) is module state
# management, not part of the eval hot path; not implemented here.


if __name__ == "__main__":
    key = jax.random.PRNGKey(0)
    kx, kl, ks = jax.random.split(key, 3)

    N, C, H, W = 2, 4, 16, 16
    x = jax.random.normal(kx, (N, C, H, W), dtype=jnp.float32)
    loc = jax.random.normal(kl, (C,), dtype=jnp.float32) * 0.1
    scale = 1.0 + jax.random.normal(ks, (C,), dtype=jnp.float32) * 0.1

    # 4-D path.
    out = jax.block_until_ready(actnorm_forward(x, loc, scale))
    ref = scale.reshape(1, C, 1, 1) * (x + loc.reshape(1, C, 1, 1))
    assert out.shape == (N, C, H, W)
    assert jnp.allclose(out, ref, atol=1e-6, rtol=1e-6)

    # 2-D (squeeze) path: channels stay on the lane axis.
    x2d = jax.random.normal(kx, (N, C), dtype=jnp.float32)
    out2d = jax.block_until_ready(actnorm_forward(x2d, loc, scale))
    ref2d = scale.reshape(1, C) * (x2d + loc.reshape(1, C))
    assert out2d.shape == (N, C)
    assert jnp.allclose(out2d, ref2d, atol=1e-6, rtol=1e-6)

    # Reverse path (forward(input, reverse=True)) round-trips the forward.
    rev = jax.block_until_ready(actnorm_forward(out, loc, scale, reverse=True))
    assert jnp.allclose(rev, x, atol=1e-5, rtol=1e-5)

    # Ragged grid path: N*C not a multiple of 8, H*W not a multiple of 128.
    Nr, Cr, Hr, Wr = 3, 4, 20, 20
    xr = jax.random.normal(ks, (Nr, Cr, Hr, Wr), dtype=jnp.float32)
    locr = jnp.concatenate([loc, loc])[:Cr]
    scaler = jnp.concatenate([scale, scale])[:Cr]
    outr = jax.block_until_ready(actnorm_forward(xr, locr, scaler))
    refr = scaler.reshape(1, Cr, 1, 1) * (xr + locr.reshape(1, Cr, 1, 1))
    assert jnp.allclose(outr, refr, atol=1e-6, rtol=1e-6)

    # Small-H*W lane-density guard path: H*W < 128 -> (N, C*H*W) layout.
    Ns, Cs, Hs, Ws = 2, 8, 8, 8
    xs = jax.random.normal(kl, (Ns, Cs, Hs, Ws), dtype=jnp.float32)
    locs = jnp.tile(loc, (2,))[:Cs]
    scales = jnp.tile(scale, (2,))[:Cs]
    outs = jax.block_until_ready(actnorm_forward(xs, locs, scales))
    refs = scales.reshape(1, Cs, 1, 1) * (xs + locs.reshape(1, Cs, 1, 1))
    assert jnp.allclose(outs, refs, atol=1e-6, rtol=1e-6)

    # bf16 path: params stay f32 inside the kernel, output cast back to bf16.
    xb = x.astype(jnp.bfloat16)
    outb = jax.block_until_ready(actnorm_forward(xb, loc, scale))
    refb = (scale.reshape(1, C, 1, 1)
            * (xb.astype(jnp.float32) + loc.reshape(1, C, 1, 1)))
    assert outb.dtype == jnp.bfloat16
    assert jnp.allclose(outb.astype(jnp.float32), refb, atol=2e-2, rtol=2e-2)

    # logdet path (fused second output; literal reference semantics:
    # tensor-valued dlogdet = h * W * sum(log|scale|)).
    h_ld, dlogdet = actnorm_forward(x, loc, scale, logdet=True)
    jax.block_until_ready(dlogdet)
    assert h_ld.shape == (N, C, H, W) and dlogdet.shape == (N, C, H, W)
    assert jnp.allclose(h_ld, ref, atol=1e-6, rtol=1e-6)
    assert jnp.allclose(
        dlogdet, ref * W * jnp.sum(jnp.log(jnp.abs(scale))), atol=1e-5, rtol=1e-5
    )

    print("KERNEL_OK")
</pallas_src>

<mosaic_0001>
module attributes {stable_mosaic.version = 11 : i64} {
  func.func @_actnorm_kernel(%arg0: i32, %arg1: i32, %arg2: memref<8x256xf32, #tpu.memory_space<vmem>>, %arg3: memref<8x1xf32, #tpu.memory_space<vmem>>, %arg4: memref<8x1xf32, #tpu.memory_space<vmem>>, %arg5: memref<8x256xf32, #tpu.memory_space<vmem>>) attributes {dimension_semantics = [#tpu.dimension_semantics<parallel>, #tpu.dimension_semantics<parallel>], iteration_bounds = array<i64: 1, 1>, scalar_prefetch = 0 : i64, scratch_operands = 0 : i64, tpu.core_type = #tpu.core_type<tc>, window_params = [{transform_indices = @transform_0, window_bounds = array<i64: 8, 256>}, {transform_indices = @transform_1, window_bounds = array<i64: 8, 1>}, {transform_indices = @transform_2, window_bounds = array<i64: 8, 1>}, {transform_indices = @transform_3, window_bounds = array<i64: 8, 256>}]} {
    %c0 = arith.constant 0 : index
    %c0_0 = arith.constant 0 : index
    %0 = vector.load %arg4[%c0, %c0_0] : memref<8x1xf32, #tpu.memory_space<vmem>>, vector<8x1xf32>
    %c0_1 = arith.constant 0 : index
    %c0_2 = arith.constant 0 : index
    %1 = vector.load %arg2[%c0_1, %c0_2] : memref<8x256xf32, #tpu.memory_space<vmem>>, vector<8x256xf32>
    %c0_3 = arith.constant 0 : index
    %c0_4 = arith.constant 0 : index
    %2 = vector.load %arg3[%c0_3, %c0_4] : memref<8x1xf32, #tpu.memory_space<vmem>>, vector<8x1xf32>
    %3 = vector.broadcast %2 : vector<8x1xf32> to vector<8x256xf32>
    %4 = arith.addf %1, %3 : vector<8x256xf32>
    %5 = vector.broadcast %0 : vector<8x1xf32> to vector<8x256xf32>
    %6 = arith.mulf %5, %4 : vector<8x256xf32>
    %c0_5 = arith.constant 0 : index
    %c0_6 = arith.constant 0 : index
    %7 = vector.load %arg5[%c0_5, %c0_6] : memref<8x256xf32, #tpu.memory_space<vmem>>, vector<8x256xf32>
    tpu.vector_store %arg5[%c0_5, %c0_6], %6 {strides = array<i32>} : memref<8x256xf32, #tpu.memory_space<vmem>>, vector<8x256xf32>,
    return
  }
  func.func @transform_0(%arg0: i32, %arg1: i32) -> (i32, i32) {
    %c0_i32 = arith.constant 0 : i32
    return %arg0, %arg1 : i32, i32
  }
  func.func @transform_1(%arg0: i32, %arg1: i32) -> (i32, i32) {
    %c0_i32 = arith.constant 0 : i32
    %c0_i32_0 = arith.constant 0 : i32
    return %arg0, %c0_i32 : i32, i32
  }
  func.func @transform_2(%arg0: i32, %arg1: i32) -> (i32, i32) {
    %c0_i32 = arith.constant 0 : i32
    %c0_i32_0 = arith.constant 0 : i32
    return %arg0, %c0_i32 : i32, i32
  }
  func.func @transform_3(%arg0: i32, %arg1: i32) -> (i32, i32) {
    %c0_i32 = arith.constant 0 : i32
    return %arg0, %arg1 : i32, i32
  }
}

</mosaic_0001>

<bundles_post_ra>
// kernel: tpu_custom_call.1
= control target key start
LH: loop header
LB: loop body
LE: loop exit
PB: predicated region body
PF: predicated region fallthrough
CT: control target
= control target key end

     0   :  { %s117_s0 = inlined_call_operand.vmem [shape: f32[8,256], index: 0, kind: input, shape index: {}]   ;;  %s118_s1 = inlined_call_operand.vmem [shape: f32[8,1], index: 1, kind: input, shape index: {}]   ;;  %s119_s2 = inlined_call_operand.vmem [shape: f32[8,1], index: 2, kind: input, shape index: {}]   ;;  %s120_s3 = inlined_call_operand.hbm [shape: f32[8,256], index: 3, kind: output, shape index: {}]  }
   0x1   :  { %v18_v0 = vld [vmem:[%s118_s1] sm:$0xff] }
   0x2   :  { %8 = vsyncpa [#allocation3], 0  ;;  %v80_v1 = vmov 0   ;;  %v15_v2 = vld [vmem:[%s119_s2] sm:$0xff]  ;;  %v17_v5 = vld [vmem:[%s117_s0 + $0x8] sm:$0xff]  ;;  %s81_s1 = smov [#allocation2]  }
   0x3   :  { %53 = vset.pattern.permute.xlu0 %v80_v1  ;;  %v16_v4 = vld [vmem:[%s117_s0] sm:$0xff]  ;;  %s40_s20 = sshll.u32 %s81_s1, 4  ;;  %s42_s23 = sshll.u32 %s120_s3, 4  ;;  %s41_s20 = int_to_ptr.vmem [resolvable:$true] %s40_s20  ;;  %s43_s23 = int_to_ptr.hbm [resolvable:$true] %s42_s23 }
   0x4   :  { %21 = vperm.xlu0 %53, %v18_v0  }
   0xc   :  { %28 = vperm.xlu0 %53, %v15_v2  }
  0x76   :  { %v22_v3 = vpop.permute.xlu0 %21 }
  0x77   :  { %v24_v6 = vadd.f32 %v22_v3, %v16_v4  ;;  %v25_v7 = vadd.f32 %v22_v3, %v17_v5 }
  0x7e   :  { %v29_v8 = vpop.permute.xlu0 %28 }
  0x7f   :  { %v31_v9 = vmul.f32 %v29_v8, %v24_v6  ;;  %v32_v10 = vmul.f32 %v29_v8, %v25_v7 }
  0x81   :  { %33 = vst [vmem:[#allocation2] sm:$0xff] %v31_v9 }
  0x82   :  { %34 = vst [vmem:[#allocation2 + $0x8] sm:$0xff] %v32_v10 }
  0x83   :  { %45 = dma.vmem_to_hbm [thread:$0]  %s41_s20, 256, %s43_s23, [#allocation3]  }
  0x84   :  { %78 = dma.done.wait [#allocation3], 256  }
  0x85   :  { %79 = vsyncadd [#allocation3], 4294967040 }
  0x86   :  { %50 = vsyncpa [#allocation3], 1 }

</bundles_post_ra>
